<compile_context>
chip_gen: v6e
topology: v6e:2x2x1
jax: 0.10.0
libtpu: 0.0.40
codegen_flags: <defaults>
</compile_context>

<pallas_src>
import math

import jax
import jax.numpy as jnp
from jax.experimental import pallas as pl
from jax.experimental.pallas import tpu as pltpu

# ---- problem sizes (small, consistent with the module) ----
BATCH = 2
STATE_SIZE = 16
ACTION_SIZE = 4
H1 = 64
H2 = 32
BN_EPS = 1e-5          # nn.BatchNorm1d default
LEAKY_SLOPE = 0.01     # F.leaky_relu default
LANES = 128            # vreg lane width / MXU-friendly padding


def _round16(n):
    # bf16 packs two rows per sublane -> keep slab regions 16-row aligned.
    return ((n + 15) // 16) * 16


# Row offsets inside the packed bf16 weight slab (all 16-row aligned).
ROW_W1 = 0                                   # w1: rows [0, 16)   lanes [0, H1)
ROW_W2S = ROW_W1 + _round16(STATE_SIZE)      # 16  w2[:H1]: 64 rows, lanes [0, H2)
ROW_W2A = ROW_W2S + H1                       # 80  w2[H1:]: 4 rows, lanes [0, H2)
ROW_W3 = ROW_W2A + _round16(ACTION_SIZE)     # 96  w3: 32 rows, lanes [0, ACTION_SIZE)
SLAB_ROWS = ROW_W3 + H2                      # 128
BIAS_ROWS = 8                                # f32 bias slab: rows 0/1/2 = b1/b2/b3


def nn_model_kernel(state_ref, action_ref, bn_ref, w_ref, bias_ref, out_ref):
    """One row-block of the forward pass.

    Resident-across-grid inputs (constant index_map): bn_ref (full-batch BN
    mean / inv-std), w_ref (bf16 packed weights), bias_ref (f32 biases).
    Per-block inputs: state_ref (tile_m, S), action_ref (tile_m, A).
    """
    # --- BatchNorm1d (training mode, gamma=1, beta=0) with precomputed stats ---
    mean = bn_ref[0:1, :]                                         # (1, S) f32
    invstd = bn_ref[1:2, :]                                       # (1, S) f32
    x = (state_ref[...] - mean) * invstd                          # (tm, S) f32

    # --- static, aligned views into the resident weight / bias slabs ---
    w1 = w_ref[ROW_W1:ROW_W1 + STATE_SIZE, :]                     # (16, 128) bf16
    w2s = w_ref[ROW_W2S:ROW_W2S + H1, :]                          # (64, 128) bf16
    w2a = w_ref[ROW_W2A:ROW_W2A + ACTION_SIZE, :]                 # (4, 128)  bf16
    w3 = w_ref[ROW_W3:ROW_W3 + H2, :]                             # (32, 128) bf16
    b1 = bias_ref[0:1, :]                                         # (1, 128) f32
    b2 = bias_ref[1:2, :]
    b3 = bias_ref[2:3, :]

    # --- Linear 1 + leaky_relu ---
    h1 = jnp.dot(x.astype(jnp.bfloat16), w1,
                 preferred_element_type=jnp.float32) + b1         # (tm, 128)
    h1 = jnp.maximum(h1, LEAKY_SLOPE * h1)

    # --- concat(action) + Linear 2 + leaky_relu, as two MXU pushes ---
    h2 = (jnp.dot(h1[:, :H1].astype(jnp.bfloat16), w2s,
                  preferred_element_type=jnp.float32)
          + jnp.dot(action_ref[...].astype(jnp.bfloat16), w2a,
                    preferred_element_type=jnp.float32)
          + b2)                                                   # (tm, 128)
    h2 = jnp.maximum(h2, LEAKY_SLOPE * h2)

    # --- Linear 3 + tanh ---
    h3 = jnp.dot(h2[:, :H2].astype(jnp.bfloat16), w3,
                 preferred_element_type=jnp.float32) + b3         # (tm, 128)
    out_ref[...] = jnp.tanh(h3)                                   # lane-dense store


def pack_params(params):
    """Pack weights into ONE bf16 (128, 128) slab + biases into a tiny f32 slab.
    Done once outside the hot path; both stay VMEM-resident across grid steps."""
    w1, b1, w2, b2, w3, b3 = params
    slab = jnp.zeros((SLAB_ROWS, LANES), jnp.float32)
    slab = slab.at[ROW_W1:ROW_W1 + STATE_SIZE, :H1].set(w1)
    slab = slab.at[ROW_W2S:ROW_W2S + H1, :H2].set(w2[:H1])
    slab = slab.at[ROW_W2A:ROW_W2A + ACTION_SIZE, :H2].set(w2[H1:])
    slab = slab.at[ROW_W3:ROW_W3 + H2, :ACTION_SIZE].set(w3)
    bias = jnp.zeros((BIAS_ROWS, LANES), jnp.float32)
    bias = bias.at[0, :H1].set(b1.reshape(-1))
    bias = bias.at[1, :H2].set(b2.reshape(-1))
    bias = bias.at[2, :ACTION_SIZE].set(b3.reshape(-1))
    return slab.astype(jnp.bfloat16), bias


@jax.jit
def nn_model_forward(state, action, weight_slab, bias_slab):
    """Single gridded pallas_call over row blocks; weights/biases/BN-stats are
    DMA'd once (constant index_map) and reused by every grid step."""
    b = state.shape[0]

    # Full-batch BatchNorm statistics (exact; must NOT be per grid tile).
    mean = jnp.mean(state, axis=0, keepdims=True)
    var = jnp.mean(jnp.square(state - mean), axis=0, keepdims=True)
    bn = jnp.concatenate([mean, jax.lax.rsqrt(var + BN_EPS)], axis=0)   # (2, S)

    tile_m = min(b, 128)
    m_pad = pl.cdiv(b, tile_m) * tile_m
    if m_pad != b:
        state = jnp.pad(state, ((0, m_pad - b), (0, 0)))
        action = jnp.pad(action, ((0, m_pad - b), (0, 0)))

    out = pl.pallas_call(
        nn_model_kernel,
        out_shape=jax.ShapeDtypeStruct((m_pad, LANES), jnp.float32),
        grid=(m_pad // tile_m,),
        in_specs=[
            pl.BlockSpec((tile_m, STATE_SIZE), lambda i: (i, 0)),        # state
            pl.BlockSpec((tile_m, ACTION_SIZE), lambda i: (i, 0)),       # action
            pl.BlockSpec((2, STATE_SIZE), lambda i: (0, 0)),             # BN stats (resident)
            pl.BlockSpec((SLAB_ROWS, LANES), lambda i: (0, 0)),          # bf16 weights (resident)
            pl.BlockSpec((BIAS_ROWS, LANES), lambda i: (0, 0)),          # f32 biases (resident)
        ],
        out_specs=pl.BlockSpec((tile_m, LANES), lambda i: (i, 0)),
        compiler_params=pltpu.CompilerParams(
            dimension_semantics=("parallel",)),                          # 2x on v7x megacore
    )(state, action, bn, weight_slab, bias_slab)
    return out[:b, :ACTION_SIZE]


def nn_model_reference_f32(state, action, params):
    """Plain-JAX f32 reference of the module forward (training-mode BN)."""
    w1, b1, w2, b2, w3, b3 = params
    mean = jnp.mean(state, axis=0, keepdims=True)
    var = jnp.mean(jnp.square(state - mean), axis=0, keepdims=True)
    x = (state - mean) * jax.lax.rsqrt(var + BN_EPS)
    h1 = x @ w1 + b1
    h1 = jnp.where(h1 >= 0.0, h1, LEAKY_SLOPE * h1)
    h1c = jnp.concatenate([h1, action], axis=1)
    h2 = h1c @ w2 + b2
    h2 = jnp.where(h2 >= 0.0, h2, LEAKY_SLOPE * h2)
    return jnp.tanh(h2 @ w3 + b3)


def nn_model_reference_bf16(state, action, params):
    """Reference with the same bf16-dot-inputs / f32-accumulate arithmetic as the kernel."""
    w1, b1, w2, b2, w3, b3 = params

    def bdot(a, b_):
        return jnp.dot(a.astype(jnp.bfloat16), b_.astype(jnp.bfloat16),
                       preferred_element_type=jnp.float32)

    mean = jnp.mean(state, axis=0, keepdims=True)
    var = jnp.mean(jnp.square(state - mean), axis=0, keepdims=True)
    x = (state - mean) * jax.lax.rsqrt(var + BN_EPS)
    h1 = bdot(x, w1) + b1
    h1 = jnp.where(h1 >= 0.0, h1, LEAKY_SLOPE * h1)
    h1c = jnp.concatenate([h1, action], axis=1)
    h2 = bdot(h1c, w2) + b2
    h2 = jnp.where(h2 >= 0.0, h2, LEAKY_SLOPE * h2)
    return jnp.tanh(bdot(h2, w3) + b3)


def init_params(key):
    """Deterministic init mirroring NnModel.reset_parameters(): linear weights
    ~ U(-1/sqrt(fan), 1/sqrt(fan)) with hidden_init's fan = weight.size()[0]
    (out_features). Stored as (in, out)."""
    ks = jax.random.split(key, 6)
    lim1 = 1.0 / math.sqrt(H1)
    lim2 = 1.0 / math.sqrt(H2)
    lim3 = 1.0 / math.sqrt(ACTION_SIZE)
    w1 = jax.random.uniform(ks[0], (STATE_SIZE, H1), jnp.float32, -lim1, lim1)
    b1 = jax.random.uniform(ks[1], (1, H1), jnp.float32, -lim1, lim1)
    w2 = jax.random.uniform(ks[2], (H1 + ACTION_SIZE, H2), jnp.float32, -lim2, lim2)
    b2 = jax.random.uniform(ks[3], (1, H2), jnp.float32, -lim2, lim2)
    w3 = jax.random.uniform(ks[4], (H2, ACTION_SIZE), jnp.float32, -lim3, lim3)
    b3 = jax.random.uniform(ks[5], (1, ACTION_SIZE), jnp.float32, -lim3, lim3)
    return (w1, b1, w2, b2, w3, b3)


# TODO(synk): conv2d / rnn / maxpool2d / softmax / clamp branches of the
# config-driven module are not exercised by this (batchnorm + linear) config.

if __name__ == "__main__":
    key = jax.random.PRNGKey(0)
    k_state, k_action, k_params, k_big = jax.random.split(key, 4)

    params = init_params(k_params)
    weight_slab, bias_slab = pack_params(params)   # packed once, reused every call

    # --- small-shape check (module-consistent: batch=2) ---
    state = jax.random.normal(k_state, (BATCH, STATE_SIZE), jnp.float32)
    action = jax.random.normal(k_action, (BATCH, ACTION_SIZE), jnp.float32)

    out = nn_model_forward(state, action, weight_slab, bias_slab)
    out = jax.block_until_ready(out)
    assert out.shape == (BATCH, ACTION_SIZE)

    ref_bf16 = nn_model_reference_bf16(state, action, params)
    ref_f32 = nn_model_reference_f32(state, action, params)
    # tight vs a reference using the same bf16-input / f32-accumulate dots
    assert jnp.allclose(out, ref_bf16, atol=2e-3, rtol=0), "mismatch vs bf16-matched reference"
    # loose vs pure-f32 module semantics (bf16 MXU inputs cost ~1e-3 level error)
    assert jnp.allclose(out, ref_f32, atol=3e-2, rtol=0), "mismatch vs f32 reference"

    # --- larger batch: exercises the multi-step grid with VMEM-resident weights ---
    BIG = 256
    kb_s, kb_a = jax.random.split(k_big)
    state_b = jax.random.normal(kb_s, (BIG, STATE_SIZE), jnp.float32)
    action_b = jax.random.normal(kb_a, (BIG, ACTION_SIZE), jnp.float32)
    out_b = jax.block_until_ready(nn_model_forward(state_b, action_b, weight_slab, bias_slab))
    ref_b = nn_model_reference_bf16(state_b, action_b, params)
    assert out_b.shape == (BIG, ACTION_SIZE)
    assert jnp.allclose(out_b, ref_b, atol=2e-3, rtol=0), "gridded-batch mismatch"

    print("KERNEL_OK")
</pallas_src>

<mosaic_0001>
module attributes {stable_mosaic.version = 11 : i64} {
  func.func @nn_model_kernel(%arg0: i32, %arg1: memref<2x16xf32, #tpu.memory_space<vmem>>, %arg2: memref<2x4xf32, #tpu.memory_space<vmem>>, %arg3: memref<2x16xf32, #tpu.memory_space<vmem>>, %arg4: memref<128x128xbf16, #tpu.memory_space<vmem>>, %arg5: memref<8x128xf32, #tpu.memory_space<vmem>>, %arg6: memref<2x128xf32, #tpu.memory_space<vmem>>) attributes {dimension_semantics = [#tpu.dimension_semantics<parallel>], iteration_bounds = array<i64: 1>, scalar_prefetch = 0 : i64, scratch_operands = 0 : i64, tpu.core_type = #tpu.core_type<tc>, window_params = [{transform_indices = @transform_0, window_bounds = array<i64: 2, 16>}, {transform_indices = @transform_1, window_bounds = array<i64: 2, 4>}, {pipeline_mode = #tpu.pipeline_mode<synchronous>, transform_indices = @transform_2, window_bounds = array<i64: 2, 16>}, {pipeline_mode = #tpu.pipeline_mode<synchronous>, transform_indices = @transform_3, window_bounds = array<i64: 128, 128>}, {pipeline_mode = #tpu.pipeline_mode<synchronous>, transform_indices = @transform_4, window_bounds = array<i64: 8, 128>}, {transform_indices = @transform_5, window_bounds = array<i64: 2, 128>}]} {
    %c0 = arith.constant 0 : index
    %c0_0 = arith.constant 0 : index
    %0 = vector.load %arg3[%c0, %c0_0] : memref<2x16xf32, #tpu.memory_space<vmem>>, vector<1x16xf32>
    %c1 = arith.constant 1 : index
    %c0_1 = arith.constant 0 : index
    %1 = vector.load %arg3[%c1, %c0_1] : memref<2x16xf32, #tpu.memory_space<vmem>>, vector<1x16xf32>
    %c0_2 = arith.constant 0 : index
    %c0_3 = arith.constant 0 : index
    %2 = vector.load %arg1[%c0_2, %c0_3] : memref<2x16xf32, #tpu.memory_space<vmem>>, vector<2x16xf32>
    %3 = vector.broadcast %0 : vector<1x16xf32> to vector<2x16xf32>
    %4 = arith.subf %2, %3 : vector<2x16xf32>
    %5 = vector.broadcast %1 : vector<1x16xf32> to vector<2x16xf32>
    %6 = arith.mulf %4, %5 : vector<2x16xf32>
    %c0_4 = arith.constant 0 : index
    %c0_5 = arith.constant 0 : index
    %7 = vector.load %arg4[%c0_4, %c0_5] : memref<128x128xbf16, #tpu.memory_space<vmem>>, vector<16x128xbf16>
    %c16 = arith.constant 16 : index
    %c0_6 = arith.constant 0 : index
    %8 = vector.load %arg4[%c16, %c0_6] : memref<128x128xbf16, #tpu.memory_space<vmem>>, vector<64x128xbf16>
    %c80 = arith.constant 80 : index
    %c0_7 = arith.constant 0 : index
    %9 = vector.load %arg4[%c80, %c0_7] : memref<128x128xbf16, #tpu.memory_space<vmem>>, vector<4x128xbf16>
    %c96 = arith.constant 96 : index
    %c0_8 = arith.constant 0 : index
    %10 = vector.load %arg4[%c96, %c0_8] : memref<128x128xbf16, #tpu.memory_space<vmem>>, vector<32x128xbf16>
    %c0_9 = arith.constant 0 : index
    %c0_10 = arith.constant 0 : index
    %11 = vector.load %arg5[%c0_9, %c0_10] : memref<8x128xf32, #tpu.memory_space<vmem>>, vector<1x128xf32>
    %c1_11 = arith.constant 1 : index
    %c0_12 = arith.constant 0 : index
    %12 = vector.load %arg5[%c1_11, %c0_12] : memref<8x128xf32, #tpu.memory_space<vmem>>, vector<1x128xf32>
    %c2 = arith.constant 2 : index
    %c0_13 = arith.constant 0 : index
    %13 = vector.load %arg5[%c2, %c0_13] : memref<8x128xf32, #tpu.memory_space<vmem>>, vector<1x128xf32>
    %14 = arith.truncf %6 : vector<2x16xf32> to vector<2x16xbf16>
    %cst = arith.constant dense<0.000000e+00> : vector<2x128xf32>
    %15 = tpu.matmul %14, %7, %cst {dimension_numbers = #tpu.dot_dimension_numbers<[1], [0], [0], [1], [0, 0, 1, 1], [], []>} : vector<2x16xbf16>, vector<16x128xbf16>, vector<2x128xf32> -> vector<2x128xf32>
    %16 = vector.broadcast %11 : vector<1x128xf32> to vector<2x128xf32>
    %17 = arith.addf %15, %16 : vector<2x128xf32>
    %cst_14 = arith.constant 0.00999999977 : f32
    %18 = vector.broadcast %cst_14 : f32 to vector<2x128xf32>
    %19 = arith.mulf %18, %17 : vector<2x128xf32>
    %20 = arith.maximumf %17, %19 : vector<2x128xf32>
    %21 = vector.extract_strided_slice %20 {offsets = [0, 0], sizes = [2, 64], strides = [1, 1]} : vector<2x128xf32> to vector<2x64xf32>
    %22 = arith.truncf %21 : vector<2x64xf32> to vector<2x64xbf16>
    %cst_15 = arith.constant dense<0.000000e+00> : vector<2x128xf32>
    %23 = tpu.matmul %22, %8, %cst_15 {dimension_numbers = #tpu.dot_dimension_numbers<[1], [0], [0], [1], [0, 0, 1, 1], [], []>} : vector<2x64xbf16>, vector<64x128xbf16>, vector<2x128xf32> -> vector<2x128xf32>
    %c0_16 = arith.constant 0 : index
    %c0_17 = arith.constant 0 : index
    %24 = vector.load %arg2[%c0_16, %c0_17] : memref<2x4xf32, #tpu.memory_space<vmem>>, vector<2x4xf32>
    %25 = arith.truncf %24 : vector<2x4xf32> to vector<2x4xbf16>
    %cst_18 = arith.constant dense<0.000000e+00> : vector<2x128xf32>
    %26 = tpu.matmul %25, %9, %cst_18 {dimension_numbers = #tpu.dot_dimension_numbers<[1], [0], [0], [1], [0, 0, 1, 1], [], []>} : vector<2x4xbf16>, vector<4x128xbf16>, vector<2x128xf32> -> vector<2x128xf32>
    %27 = arith.addf %23, %26 : vector<2x128xf32>
    %28 = vector.broadcast %12 : vector<1x128xf32> to vector<2x128xf32>
    %29 = arith.addf %27, %28 : vector<2x128xf32>
    %cst_19 = arith.constant 0.00999999977 : f32
    %30 = vector.broadcast %cst_19 : f32 to vector<2x128xf32>
    %31 = arith.mulf %30, %29 : vector<2x128xf32>
    %32 = arith.maximumf %29, %31 : vector<2x128xf32>
    %33 = vector.extract_strided_slice %32 {offsets = [0, 0], sizes = [2, 32], strides = [1, 1]} : vector<2x128xf32> to vector<2x32xf32>
    %34 = arith.truncf %33 : vector<2x32xf32> to vector<2x32xbf16>
    %cst_20 = arith.constant dense<0.000000e+00> : vector<2x128xf32>
    %35 = tpu.matmul %34, %10, %cst_20 {dimension_numbers = #tpu.dot_dimension_numbers<[1], [0], [0], [1], [0, 0, 1, 1], [], []>} : vector<2x32xbf16>, vector<32x128xbf16>, vector<2x128xf32> -> vector<2x128xf32>
    %36 = vector.broadcast %13 : vector<1x128xf32> to vector<2x128xf32>
    %37 = arith.addf %35, %36 : vector<2x128xf32>
    %38 = math.tanh %37 : vector<2x128xf32>
    %c0_21 = arith.constant 0 : index
    %c0_22 = arith.constant 0 : index
    %39 = vector.load %arg6[%c0_21, %c0_22] : memref<2x128xf32, #tpu.memory_space<vmem>>, vector<2x128xf32>
    tpu.vector_store %arg6[%c0_21, %c0_22], %38 {strides = array<i32>} : memref<2x128xf32, #tpu.memory_space<vmem>>, vector<2x128xf32>,
    return
  }
  func.func @transform_0(%arg0: i32) -> (i32, i32) {
    %c0_i32 = arith.constant 0 : i32
    %c0_i32_0 = arith.constant 0 : i32
    return %arg0, %c0_i32 : i32, i32
  }
  func.func @transform_1(%arg0: i32) -> (i32, i32) {
    %c0_i32 = arith.constant 0 : i32
    %c0_i32_0 = arith.constant 0 : i32
    return %arg0, %c0_i32 : i32, i32
  }
  func.func @transform_2(%arg0: i32) -> (i32, i32) {
    %c0_i32 = arith.constant 0 : i32
    %c0_i32_0 = arith.constant 0 : i32
    %c0_i32_1 = arith.constant 0 : i32
    return %c0_i32, %c0_i32_0 : i32, i32
  }
  func.func @transform_3(%arg0: i32) -> (i32, i32) {
    %c0_i32 = arith.constant 0 : i32
    %c0_i32_0 = arith.constant 0 : i32
    %c0_i32_1 = arith.constant 0 : i32
    return %c0_i32, %c0_i32_0 : i32, i32
  }
  func.func @transform_4(%arg0: i32) -> (i32, i32) {
    %c0_i32 = arith.constant 0 : i32
    %c0_i32_0 = arith.constant 0 : i32
    %c0_i32_1 = arith.constant 0 : i32
    return %c0_i32, %c0_i32_0 : i32, i32
  }
  func.func @transform_5(%arg0: i32) -> (i32, i32) {
    %c0_i32 = arith.constant 0 : i32
    %c0_i32_0 = arith.constant 0 : i32
    return %arg0, %c0_i32 : i32, i32
  }
}

</mosaic_0001>

<bundles_post_ra>
// kernel: nn_model_forward.1
= control target key start
LH: loop header
LB: loop body
LE: loop exit
PB: predicated region body
PF: predicated region fallthrough
CT: control target
= control target key end

     0   :  { %10 = vsyncpa [#allocation3], 0  ;;  %s514_s0 = inlined_call_operand.vmem [shape: f32[2,16], index: 0, kind: input, shape index: {}]   ;;  %s515_s1 = inlined_call_operand.vmem [shape: f32[2,4], index: 1, kind: input, shape index: {}]   ;;  %s516_s2 = inlined_call_operand.vmem [shape: f32[2,16], index: 2, kind: input, shape index: {}]   ;;  %s517_s3 = inlined_call_operand.hbm [shape: bf16[128,128], index: 3, kind: input, shape index: {}]   ;;  %s518_s4 = inlined_call_operand.vmem [shape: f32[8,128], index: 4, kind: input, shape index: {}]   ;;  %s519_s5 = inlined_call_operand.hbm [shape: f32[2,128], index: 5, kind: output, shape index: {}]  }
   0x1   :  { %11 = vsyncpa [#allocation4], 0  ;;  %s447_s18 = smov [#allocation2]  }
   0x2   :  { %s23_s19 = sshll.u32 %s447_s18, 4  ;;  %s24_s19 = int_to_ptr.vmem [resolvable:$true] %s23_s19 }
   0x3   :  { %s411_s20 = scalar_lea.vmem %s24_s19, 1024  ;;  %p416_p1 = scmp.lt.s32.totalorder %s24_s19, %s24_s19 }
   0x4   :  { %p412_p0 = scmp.ne.s32.totalorder %s24_s19, %s411_s20  ;;  %p417_p2 = scmp.lt.s32.totalorder %s411_s20, %s411_s20 }
   0x6   :  { %p418_p3 = por %p417_p2, %p416_p1 }
   0x8   :  { %p419_p4 = pnand %p418_p3, %p412_p0 }
   0xa   :  { %422 = shalt.err (!%p419_p4)
}
   0xb   :  { %s448_s21 = smov 64   ;;  %s449_s22 = smov 4  }
   0xc   :  { %29 = dma.hbm_to_vmem [thread:$0]  %s517_s3, 1024, %s24_s19, [#allocation3], %s448_s21, %s448_s21, %s449_s22  }
   0xd   :  { %443 = dma.done.wait [#allocation3], 1024  }
   0xe   :  { %444 = vsyncadd [#allocation3], 4294966272  ;;  %v450_v0 = vmov 0.0   ;;  %vm451_vm0 = vmmov 0   ;;  %v394_v1 = vld [vmem:[#allocation2] sm:$0xff]   ;;  %vm78_vm1 = vcmask 130048  }
   0xf   :  { %356 = vmatprep.subr.bf16.mxu0 %v450_v0  ;;  %358 = vmatprep.mubr.msk.bf16.mxu0 %vm451_vm0, %v450_v0  ;;  %v328_v2 = vld [vmem:[%s516_s2] ss:$0 sm:$0xff]  ;;  %v329_v3 = vld [vmem:[%s516_s2 + $0x1] ss:$0 sm:$0xff]  ;;  %v396_v9 = vld [vmem:[#allocation2 + $0x18] sm:$0xff]   ;;  %vm131_vm2 = vcmask 1041408  }
  0x10   :  { %362 = vmatprep.subr.bf16.mxu1 %v450_v0  ;;  %364 = vmatprep.mubr.msk.bf16.mxu1 %vm451_vm0, %v450_v0  ;;  %v38_v4 = vld [vmem:[%s514_s0] sm:$0x3]  ;;  %v59_v10 = vld [vmem:[#allocation2 + $0x28] sm:$0x3]  ;;  %v397_v12 = vld [vmem:[#allocation2 + $0x10] sm:$0xff]   ;;  %vm127_vm3 = vcmask 31744  }
  0x11   :  { %357 = vmatpush3.bf16.msra.mxu0 %v394_v1  ;;  %v43_v5 = vsub.f32 %v38_v4, %v328_v2  ;;  %v395_v7 = vld [vmem:[#allocation2 + $0x20] sm:$0xff]   ;;  %v133_v11 = vsel %vm131_vm2, %v59_v10, 0  ;;  %v398_v15 = vld [vmem:[#allocation2 + $0x8] sm:$0xff]   ;;  %vm199_vm4 = vcmask 523264   ;;  %v399_v29 = vld [vmem:[#allocation2 + $0x38] sm:$0xff]   ;;  %vm267_vm5 = vcmask 261120  }
  0x12   :  { %368 = vmatprep.subr.bf16.mxu0 %v450_v0  ;;  %363 = vmatpush3.bf16.msra.mxu1 %v133_v11  ;;  %v125_v13 = vld [vmem:[%s515_s1] sm:$0x3]  ;;  %v400_v30 = vld [vmem:[#allocation2 + $0x30] sm:$0xff]   ;;  %v340_v41 = vld [vmem:[%s518_s4 + $0x2] ss:$0 sm:$0xff]  ;;  %s452_s10 = smov [#allocation5]  }
  0x13   :  { %v48_v6 = vmul.f32 %v329_v3, %v43_v5  ;;  %v126_v14 = vpack.c.bf16 %v125_v13, %v125_v13  ;;  %380 = vmatprep.subr.bf16.mxu1 %v450_v0  ;;  %v330_v16 = vld [vmem:[%s518_s4] ss:$0 sm:$0xff]  ;;  %v339_v31 = vld [vmem:[%s518_s4 + $0x1] ss:$0 sm:$0xff]  ;;  %s319_s11 = sshll.u32 %s452_s10, 4  ;;  %s320_s11 = int_to_ptr.vmem [resolvable:$true] %s319_s11 }
  0x14   :  { %s423_s12 = scalar_lea.vmem %s320_s11, 32  ;;  %p428_p6 = scmp.lt.s32.totalorder %s320_s11, %s320_s11 }
  0x15   :  { %v67_v8 = vpack.c.bf16 %v48_v6, %v48_v6  ;;  %365 = vmatmul.mubr.msk.bf16.vlgmr.msra.gmra.mxu1 %vm127_vm3, %v126_v14  ;;  %p424_p5 = scmp.ne.s32.totalorder %s320_s11, %s423_s12  ;;  %p429_p7 = scmp.lt.s32.totalorder %s423_s12, %s423_s12 }
  0x16   :  { %384 = vmatprep.mubr.msk.bf16.mxu1 %vm451_vm0, %v450_v0  ;;  %381 = vmatpush3.bf16.msra.mxu1 %v399_v29 }
  0x17   :  { %359 = vmatmul.mubr.msk.bf16.vlgmr.msra.gmra.mxu0 %vm78_vm1, %v67_v8  ;;  %382 = vmatprep.subr.bf16.mxu1 %v450_v0  ;;  %p430_p8 = por %p429_p7, %p428_p6 }
  0x18   :  { %369 = vmatpush3.bf16.msra.mxu0 %v395_v7  ;;  %376 = vmatprep.mubr.msk.bf16.mxu0 %vm451_vm0, %v450_v0 }
  0x19   :  { %370 = vmatprep.subr.bf16.mxu0 %v450_v0  ;;  %p431_p9 = pnand %p430_p8, %p424_p5 }
  0x1a   :  { %383 = vmatpush3.bf16.msra.mxu1 %v400_v30 }
  0x1c   :  { %371 = vmatpush3.bf16.msra.mxu0 %v396_v9 }
  0x1d   :  { %372 = vmatprep.subr.bf16.mxu0 %v450_v0 }
  0x20   :  { %373 = vmatpush3.bf16.msra.mxu0 %v397_v12 }
  0x21   :  { %374 = vmatprep.subr.bf16.mxu0 %v450_v0 }
  0x24   :  { %375 = vmatpush3.bf16.msra.mxu0 %v398_v15 }
  0xd5   :  { %v169_v25 = vpop.f32.mrf.mxu1 }
  0xd7   :  { %v116_v17 = vpop.f32.mrf.mxu0  ;;  %v366_v26 = vpop.f32.mrf.mxu1 }
  0xd8   :  { %v117_v18 = vadd.f32 %v330_v16, %v116_v17 }
  0xd9   :  { %v360_v19 = vpop.f32.mrf.mxu0  ;;  %v172_v27 = vpop.f32.mrf.mxu1 }
  0xda   :  { %v122_v20 = vmul.f32 0.01, %v117_v18 }
  0xdb   :  { %v119_v21 = vpop.f32.mrf.mxu0  ;;  %v367_v28 = vpop.f32.mrf.mxu1 }
  0xdc   :  { %v123_v22 = vmax.f32 %v117_v18, %v122_v20 }
  0xdd   :  { %v361_v23 = vpop.f32.mrf.mxu0 }
  0xde   :  { %v124_v24 = vpack.c.bf16 %v123_v22, %v123_v22 }
  0xe0   :  { %377 = vmatmul.mubr.msk.bf16.vlgmr.msra.gmra.mxu0 %vm199_vm4, %v124_v24 }
 0x1a0   :  { %v237_v32 = vpop.f32.mrf.mxu0 }
 0x1a1   :  { %v238_v33 = vadd.f32 %v237_v32, %v169_v25 }
 0x1a2   :  { %v378_v34 = vpop.f32.mrf.mxu0 }
 0x1a3   :  { %v247_v35 = vadd.f32 %v339_v31, %v238_v33 }
 0x1a4   :  { %v240_v36 = vpop.f32.mrf.mxu0 }
 0x1a5   :  { %v248_v37 = vmul.f32 0.01, %v247_v35 }
 0x1a6   :  { %v379_v38 = vpop.f32.mrf.mxu0 }
 0x1a7   :  { %v249_v39 = vmax.f32 %v247_v35, %v248_v37 }
 0x1a9   :  { %v250_v40 = vpack.c.bf16 %v249_v39, %v249_v39 }
 0x1ab   :  { %385 = vmatmul.mubr.msk.bf16.vlgmr.msra.gmra.mxu1 %vm267_vm5, %v250_v40 }
 0x26b   :  { %v305_v42 = vpop.f32.mrf.mxu1 }
 0x26c   :  { %v306_v43 = vadd.f32 %v340_v41, %v305_v42 }
 0x26d   :  { %v386_v44 = vpop.f32.mrf.mxu1 }
 0x26e   :  { %401 = vtanh.f32 %v306_v43 }
 0x26f   :  { %v308_v45 = vpop.f32.mrf.mxu1 }
 0x271   :  { %v387_v46 = vpop.f32.mrf.mxu1 }
 0x27b   :  { %v402_v47 = vpop.eup %401 }
 0x27c   :  { %312 = vst [vmem:[#allocation5] sm:$0x3] %v402_v47 }
 0x27d   :  { %434 = shalt.err (!%p431_p9)
}
 0x27e   :  { %322 = dma.vmem_to_hbm [thread:$0]  %s320_s11, 32, %s519_s5, [#allocation4]  }
 0x27f   :  { %445 = dma.done.wait [#allocation4], 32  }
 0x280   :  { %446 = vsyncadd [#allocation4], 4294967264 }
 0x281   :  { %326 = vsyncpa [#allocation3], 1 }
 0x282   :  { %327 = vsyncpa [#allocation4], 1 }

</bundles_post_ra>
